<compile_context>
chip_gen: v6e
topology: v6e:2x2x1
jax: 0.10.0
libtpu: 0.0.40
codegen_flags: <defaults>
</compile_context>

<pallas_src>
import jax
import jax.numpy as jnp
from jax.experimental import pallas as pl
from jax.experimental.pallas import tpu as pltpu


def _round_up(x, m):
    return (x + m - 1) // m * m


def _cdiv(a, b):
    return (a + b - 1) // b


def _unpool_kernel(idx_ref, x_ref, o_ref, onehot_ref):
    # idx_ref    : (1, k)    int32 pooled-node row indices
    # x_ref      : (k, td)   pooled features, current feature tile
    # o_ref      : (tn, td)  unpooled output tile
    # onehot_ref : (tn, k)   VMEM scratch, selection matrix for this row tile
    i = pl.program_id(0)          # row-tile index (outer, parallel)
    j = pl.program_id(1)          # feature-tile index (inner, arbitrary)
    tn = o_ref.shape[0]
    k = idx_ref.shape[1]

    # One-hot depends only on the row tile -> build it once per row tile.
    @pl.when(j == 0)
    def _():
        row_ids = jax.lax.broadcasted_iota(jnp.int32, (tn, k), 0) + i * tn
        # onehot[r, p] = 1 iff global row (i*tn + r) == idx[p]; exact 0/1 in
        # the feature dtype (exact even in bf16: each output is 1*x, no accum).
        onehot_ref[...] = (row_ids == idx_ref[...]).astype(onehot_ref.dtype)

    # out[r, d] = sum_p onehot[r, p] * X[p, d]  -> rows not selected are 0.
    o_ref[...] = jnp.dot(
        onehot_ref[...], x_ref[...], preferred_element_type=jnp.float32
    ).astype(o_ref.dtype)


def graph_unpool(A, X, idx, *, tn_max=512, vmem_budget_bytes=40 * 1024 * 1024):
    """Pallas implementation of GraphUnpool.forward(A, X, idx).

    Returns (A, new_X) where new_X = zeros((A.shape[0], X.shape[1])).at[idx].set(X).
    idx is assumed to contain unique, in-range indices (top-k output).
    """
    N = A.shape[0]
    k, D = X.shape
    dtype = X.dtype
    itemsize = jnp.dtype(dtype).itemsize
    idx2 = idx.astype(jnp.int32).reshape(1, k)

    # ---- row tile: multiple of 8, large (amortize ~0.35us/step + DMA), but
    # keep >= 2 row tiles when N allows so both v7x TensorCores get work.
    tn = min(tn_max, _round_up(N, 8))
    if N > 8 and _cdiv(N, tn) < 2:
        tn = max(8, _round_up(_cdiv(N, 2), 8))

    # ---- feature tile: prefer the full feature width (single feature block:
    # X resident in VMEM, fetched once; one-hot built once per row tile; no
    # padding, no post-call slice).  Shrink to 128-multiples / smaller row
    # tiles only if the VMEM budget is exceeded.
    def footprint(tn_, td_):
        return (2 * tn_ * td_ * itemsize      # double-buffered output tile
                + 2 * k * td_ * itemsize      # double-buffered X tile
                + tn_ * k * itemsize          # one-hot scratch
                + 2 * 128 * 4)                # idx row

    td = D
    while footprint(tn, td) > vmem_budget_bytes:
        if td > 128:
            td = max(128, _round_up(td // 2, 128))
        elif tn > 8:
            tn = max(8, tn // 2)
        else:
            break

    grid = (_cdiv(N, tn), _cdiv(D, td))

    out = pl.pallas_call(
        _unpool_kernel,
        out_shape=jax.ShapeDtypeStruct((N, D), dtype),
        grid=grid,
        in_specs=[
            # idx: tiny, constant block index -> fetched once.
            pl.BlockSpec((1, k), lambda i, j: (0, 0)),
            # X: depends only on the feature tile; with td == D it is a
            # constant block index and stays resident in VMEM.
            pl.BlockSpec((k, td), lambda i, j: (0, j)),
        ],
        out_specs=pl.BlockSpec((tn, td), lambda i, j: (i, j)),
        scratch_shapes=[pltpu.VMEM((tn, k), dtype)],
        compiler_params=pltpu.CompilerParams(
            dimension_semantics=("parallel", "arbitrary"),
            vmem_limit_bytes=int(
                min(48 * 1024 * 1024,
                    max(16 * 1024 * 1024, 4 * footprint(tn, td)))),
        ),
    )(idx2, X)

    # A is returned unchanged by the module (pure pass-through, no compute).
    return A, out


if __name__ == "__main__":
    key = jax.random.PRNGKey(0)
    N, k, D = 16, 8, 32  # N unpooled nodes, k pooled nodes, D feature dim

    kA, kX, kI = jax.random.split(key, 3)
    A = jax.random.normal(kA, (N, N), dtype=jnp.float32)
    X = jax.random.normal(kX, (k, D), dtype=jnp.float32)
    idx = jax.random.permutation(kI, N)[:k].astype(jnp.int32)

    A_out, new_X = graph_unpool(A, X, idx)
    jax.block_until_ready(new_X)

    # Reference (plain JAX) check of the scatter semantics.
    ref = jnp.zeros((N, D), dtype=jnp.float32).at[idx].set(X)
    assert jnp.allclose(new_X, ref), "scatter mismatch"
    assert jnp.allclose(A_out, A), "A must be passed through unchanged"

    print("KERNEL_OK")
</pallas_src>

<mosaic_0001>
module attributes {stable_mosaic.version = 11 : i64} {
  func.func @_unpool_kernel(%arg0: i32, %arg1: i32, %arg2: memref<1x8xi32, #tpu.memory_space<vmem>>, %arg3: memref<8x32xf32, #tpu.memory_space<vmem>>, %arg4: memref<8x32xf32, #tpu.memory_space<vmem>>, %arg5: memref<8x8xf32, #tpu.memory_space<vmem>>) attributes {dimension_semantics = [#tpu.dimension_semantics<parallel>, #tpu.dimension_semantics<arbitrary>], iteration_bounds = array<i64: 2, 1>, scalar_prefetch = 0 : i64, scratch_operands = 1 : i64, tpu.core_type = #tpu.core_type<tc>, window_params = [{pipeline_mode = #tpu.pipeline_mode<synchronous>, transform_indices = @transform_0, window_bounds = array<i64: 1, 8>}, {transform_indices = @transform_1, window_bounds = array<i64: 8, 32>}, {transform_indices = @transform_2, window_bounds = array<i64: 8, 32>}]} {
    %c0_i32 = arith.constant 0 : i32
    %0 = arith.cmpi eq, %arg1, %c0_i32 : i32
    %1 = arith.extui %0 : i1 to i32
    %c0_i32_0 = arith.constant 0 : i32
    %2 = arith.cmpi ne, %1, %c0_i32_0 : i32
    scf.if %2 {
      %7 = tpu.iota {dimensions = array<i32: 0>} : vector<8x8xi32>
      %c8_i32 = arith.constant 8 : i32
      %8 = arith.muli %arg0, %c8_i32 : i32
      %9 = vector.broadcast %8 : i32 to vector<8x8xi32>
      %10 = arith.addi %7, %9 : vector<8x8xi32>
      %c0_6 = arith.constant 0 : index
      %c0_7 = arith.constant 0 : index
      %11 = vector.load %arg2[%c0_6, %c0_7] : memref<1x8xi32, #tpu.memory_space<vmem>>, vector<1x8xi32>
      %12 = vector.broadcast %11 : vector<1x8xi32> to vector<8x8xi32>
      %13 = arith.cmpi eq, %10, %12 : vector<8x8xi32>
      %14 = arith.extui %13 : vector<8x8xi1> to vector<8x8xi32>
      %15 = arith.sitofp %14 : vector<8x8xi32> to vector<8x8xf32>
      %c0_8 = arith.constant 0 : index
      %c0_9 = arith.constant 0 : index
      %16 = vector.load %arg5[%c0_8, %c0_9] : memref<8x8xf32, #tpu.memory_space<vmem>>, vector<8x8xf32>
      tpu.vector_store %arg5[%c0_8, %c0_9], %15 {strides = array<i32>} : memref<8x8xf32, #tpu.memory_space<vmem>>, vector<8x8xf32>,
    } else {
    }
    %c0 = arith.constant 0 : index
    %c0_1 = arith.constant 0 : index
    %3 = vector.load %arg5[%c0, %c0_1] : memref<8x8xf32, #tpu.memory_space<vmem>>, vector<8x8xf32>
    %c0_2 = arith.constant 0 : index
    %c0_3 = arith.constant 0 : index
    %4 = vector.load %arg3[%c0_2, %c0_3] : memref<8x32xf32, #tpu.memory_space<vmem>>, vector<8x32xf32>
    %cst = arith.constant dense<0.000000e+00> : vector<8x32xf32>
    %5 = tpu.matmul %3, %4, %cst {dimension_numbers = #tpu.dot_dimension_numbers<[1], [0], [0], [1], [0, 0, 1, 1], [], []>} : vector<8x8xf32>, vector<8x32xf32>, vector<8x32xf32> -> vector<8x32xf32>
    %c0_4 = arith.constant 0 : index
    %c0_5 = arith.constant 0 : index
    %6 = vector.load %arg4[%c0_4, %c0_5] : memref<8x32xf32, #tpu.memory_space<vmem>>, vector<8x32xf32>
    tpu.vector_store %arg4[%c0_4, %c0_5], %5 {strides = array<i32>} : memref<8x32xf32, #tpu.memory_space<vmem>>, vector<8x32xf32>,
    return
  }
  func.func @transform_0(%arg0: i32, %arg1: i32) -> (i32, i32) {
    %c0_i32 = arith.constant 0 : i32
    %c0_i32_0 = arith.constant 0 : i32
    %c0_i32_1 = arith.constant 0 : i32
    return %c0_i32, %c0_i32_0 : i32, i32
  }
  func.func @transform_1(%arg0: i32, %arg1: i32) -> (i32, i32) {
    %c0_i32 = arith.constant 0 : i32
    %c0_i32_0 = arith.constant 0 : i32
    return %c0_i32, %arg1 : i32, i32
  }
  func.func @transform_2(%arg0: i32, %arg1: i32) -> (i32, i32) {
    %c0_i32 = arith.constant 0 : i32
    return %arg0, %arg1 : i32, i32
  }
}

</mosaic_0001>

<bundles_post_ra>
// kernel: tpu_custom_call.1
= control target key start
LH: loop header
LB: loop body
LE: loop exit
PB: predicated region body
PF: predicated region fallthrough
CT: control target
= control target key end

     0   :  { %7 = vsyncpa [#allocation4], 0  ;;  %s772_s0 = inlined_call_operand.hbm [shape: s32[1,8], index: 0, kind: input, shape index: {}]   ;;  %s773_s1 = inlined_call_operand.hbm [shape: f32[8,32], index: 1, kind: input, shape index: {}]   ;;  %s774_s2 = inlined_call_operand.hbm [shape: f32[16,32], index: 2, kind: output, shape index: {}]  }
   0x1   :  { %8 = vsyncpa [#allocation7], 0 }
   0x2   :  { %9 = vsyncpa [#allocation5], 0 }
   0x3   :  { %11 = vsyncpa [#allocation5 + $0x1], 0  ;;  %s621_s9 = smov 0   ;;  %s623_s10 = smov 0  }
   0x4   :  { %s625_s11 = smov 0   ;;  %s627_s12 = smov 0  }
   0x5   :  { %s629_s13 = smov 0   ;;  %s631_s14 = smov 0  }
   0x6 LB: > { %s361_s15 = sadd.s32 4294967295, %s599_s14   ;;  %s362_s16 = sadd.s32 4294967294, %s599_s14   ;;  %s599_s14 = sphi %s631_s14, %s17_s14   ;;  %s595_s13 = sphi %s629_s13, %s792_s13   ;;  %s591_s12 = sphi %s627_s12, %s791_s12   ;;  %s587_s11 = sphi %s625_s11, %s790_s11   ;;  %s583_s10 = sphi %s623_s10, %s789_s10   ;;  %s579_s9 = sphi %s621_s9, %s788_s9  }
   0x7   : > { %s29_s17 = sadd.s32 1, %s595_s13  ;;  %s85_s18 = sadd.s32 1, %s587_s11 }
   0x8   : > { %p31_p0 = scmp.ge.s32.totalorder %s29_s17, 2  ;;  %p95_p1 = scmp.ne.s32.totalorder %s587_s11, %s583_s10 }
   0x9   : > { %p96_p2 = scmp.eq.s32.totalorder %s361_s15, 1  ;;  %p101_p3 = scmp.ne.s32.totalorder %s583_s10, %s579_s9 }
   0xa   : > { %s794_s17 = smov (%p31_p0, %s29_s17), 0  ;;  %p102_p5 = scmp.eq.s32.totalorder %s362_s16, 1 }
   0xb   : > { %p661_p4 = por %p96_p2, %p95_p1  ;;  %s80_s20 = ssub.s32 %s595_s13, %s794_s17 }
   0xc   : > { %p363_p6 = scmp.ge.s32.totalorder %s599_s14, 1  ;;  %p83_p7 = scmp.eq.s32.totalorder %s80_s20, 0 }
   0xd   : > { %s779_s19 = scalar_select %p661_p4, 1, 0 }
   0xe   : > { %p668_p8 = por %p102_p5, %p101_p3  ;;  %p109_p9 = scmp.lt.s32.totalorder %s599_s14, 3 }
   0xf   : > { %s674_s22 = scalar_select %p83_p7, %s587_s11, %s85_s18  }
  0x10   : > { %s780_s21 = scalar_select %p668_p8, 1, 0 }
  0x11   : > { %p676_p10 = pnand %p363_p6, %p109_p9  ;;  %p680_p11 = scmp.eq.s32.totalorder %s361_s15, 0 }
  0x12   : > { %s601_s25 = smov [#allocation3]   ;;  %s602_s27 = smov [#allocation6]  }
  0x13   : > { %s781_s23 = scalar_select %p676_p10, 1, 0 }
  0x14   : > { %s782_s24 = scalar_select %p680_p11, 1, 0 }
  0x15   : > { %p395_p12 = pneg %p676_p10  ;;  %s122_s26 = sshll.u32 %s601_s25, 4  ;;  %s123_s26 = int_to_ptr.vmem [resolvable:$true] %s122_s26 }
  0x16   : > { %s135_s28 = sshll.u32 %s602_s27, 4  ;;  %s474_s30 = scalar_lea.vmem %s123_s26, 16  ;;  %s136_s28 = int_to_ptr.vmem [resolvable:$true] %s135_s28 }
  0x17   : > { %p688_p13 = pnand %p680_p11, %p395_p12  ;;  %p475_p1 = scmp.ne.s32.totalorder %s123_s26, %s474_s30 }
  0x18   : > { %s481_s3 = scalar_lea.vmem %s123_s26, 32  ;;  %p482_p5 = scmp.lt.s32.totalorder %s123_s26, %s123_s26 }
  0x19   : > { %p465_p0 = pneg %p688_p13  ;;  %p483_p6 = scmp.lt.s32.totalorder %s481_s3, %s474_s30 }
  0x1b   : > { %p477_p2 = pnand %p475_p1, %p465_p0  ;;  %p484_p7 = por %p483_p6, %p482_p5 }
  0x1d   : > { %p478_p3 = pneg %p477_p2 }
  0x1f   : > { %p485_p9 = pnand %p484_p7, %p478_p3 }
  0x21   : > { %488 = shalt.err (!%p485_p9)
}
  0x22   : > { %398 = dma.hbm_to_vmem [thread:$0]  (!%p688_p13), %s772_s0, 16, %s123_s26, [#allocation4]  }
  0x23   : > { %s500_s6 = scalar_lea.vmem %s136_s28, 128  ;;  %p508_p2 = scmp.lt.s32.totalorder %s136_s28, %s136_s28 }
  0x24   : > { %p501_p12 = scmp.ne.s32.totalorder %s136_s28, %s500_s6  ;;  %p509_p4 = scmp.lt.s32.totalorder %s500_s6, %s500_s6 }
  0x26   : > { %p503_p8 = pnand %p501_p12, %p465_p0  ;;  %p510_p11 = por %p509_p4, %p508_p2 }
  0x28   : > { %p504_p1 = pneg %p503_p8 }
  0x2a   : > { %p511_p10 = pnand %p510_p11, %p504_p1 }
  0x2c   : > { %514 = shalt.err (!%p511_p10)
}
  0x2d   : > { %401 = dma.hbm_to_vmem [thread:$0]  (!%p688_p13), %s773_s1, 128, %s136_s28, [#allocation7]  }
  0x2e   : > { %p784_p3 = scmp.ne.s32.totalorder %s781_s23, 0 }
  0x2f   : > { %p785_p5 = scmp.ne.s32.totalorder (!%p784_p3), %s782_s24, 0 }
  0x30   : > { %148 = sbr.rel (%p784_p3) target bundleno = 279 (0x117), region = 28 }
  0x35   : > { %566 = dma.done.wait (%p785_p5), [#allocation4], 16  }
  0x36   : > { %568 = vsyncadd (%p785_p5), [#allocation4], 4294967280 }
  0x37   : > { %570 = dma.done.wait (%p785_p5), [#allocation7], 128  }
  0x38   : > { %572 = vsyncadd (%p785_p5), [#allocation7], 4294967168  ;;  %v173_v0 = vlaneseq  ;;  %s370_s15 = sshll.u32 %s591_s12, 3  ;;  %v603_v2 = vmov 0.0   ;;  %vm604_vm0 = vmmov 0   ;;  %v189_v6 = vld [vmem:[#allocation6] sm:$0xff] }
  0x39   : > { %v176_v1 = vstv %s370_s15  ;;  %380 = vmatprep.subr.mxu0 %v603_v2  ;;  %382 = vmatprep.mubr.msk.f32.mxu0 %vm604_vm0, %v603_v2  ;;  %v371_v5 = vld [vmem:[#allocation3] ss:$0 sm:$0xff]  ;;  %vm186_vm1 = vcmask 64512   ;;  %s166_s16 = sand.u32 1, %s583_s10   ;;  %s375_s20 = sshll.u32 %s591_s12, 7  ;;  %vm264_vm3 = vcmask 261120  }
  0x3a   : > { %v174_v3 = vshrl.u32 %v173_v0, 7  ;;  %381 = vmatpush3.msra.mxu0 %v189_v6  ;;  %s369_s18 = sshll.u32 %s166_s16, 3  ;;  %s726_s27 = scalar_lea.hbm %s774_s2, %s375_s20 }
  0x3b   : > { %s168_s23 = scalar_lea.vmem [#allocation8], %s369_s18  ;;  %s267_s28 = scalar_lea.sflag [#allocation5], %s166_s16 }
  0x3c   : > { %v177_v4 = vadd.s32 %v176_v1, %v174_v3  ;;  %s281_s24 = sshll.u32 %s168_s23, 4  ;;  %p786_p8 = scmp.ne.s32.totalorder %s779_s19, 0  ;;  %s728_s24 = int_to_ptr.vmem [resolvable:$true] %s281_s24 }
  0x3d   : > { %s515_s29 = scalar_lea.vmem %s728_s24, 128  ;;  %s605_s12 = smov [#allocation8]  }
  0x3e   : > { %vm183_vm2 = vcmp.eq.s32.totalorder %v177_v4, %v371_v5  ;;  %p516_p4 = scmp.ne.s32.totalorder %s728_s24, %s515_s29  ;;  %s519_s30 = sshll.u32 %s605_s12, 4  ;;  %s520_s30 = int_to_ptr.vmem [resolvable:$false] %s519_s30 }
  0x3f   : > { %v372_v7 = vsel %vm183_vm2, 1.0, %v603_v2  ;;  %s521_s3 = scalar_lea.vmem %s520_s30, 256  ;;  %p522_p13 = scmp.lt.s32.totalorder %s728_s24, %s520_s30 }
  0x40   : > { %187 = vst.msk [vmem:[#allocation2] sm:$0xff] %vm186_vm1, %v372_v7  ;;  %p517_p10 = pnand %p516_p4, %p786_p8  ;;  %p523_p0 = scmp.lt.s32.totalorder %s521_s3, %s515_s29 }
  0x42   : > { %p518_p11 = pneg %p517_p10  ;;  %p524_p6 = por %p523_p0, %p522_p13 }
  0x44   : > { %p525_p7 = pnand %p524_p6, %p518_p11 }
  0x47   : > { %v188_v8 = vld [vmem:[#allocation2] sm:$0xff] }
  0x48   : > { %383 = vmatmul.mubr.msk.f32.vlgmr.msra.gmra.mxu0 %vm186_vm1, %v188_v8 }
 0x108   : > { %v260_v9 = vpop.f32.mrf.mxu0 }
 0x109   : > { %265 = vst.msk [vmem:[%s168_s23] sm:$0xff] %vm264_vm3, %v260_v9 }
 0x10a   : > { %v384_v10 = vpop.f32.mrf.mxu0 }
 0x10b   : > { %528 = shalt.err (!%p525_p7)
}
 0x10c   : > { %s529_s4 = scalar_lea.hbm %s726_s27, 128  ;;  %s533_s7 = scalar_lea.hbm %s774_s2, 256 }
 0x10d   : > { %p530_p9 = scmp.ne.s32.totalorder %s726_s27, %s529_s4  ;;  %p534_p2 = scmp.lt.s32.totalorder %s726_s27, %s774_s2 }
 0x10e   : > { %p535_p3 = scmp.lt.s32.totalorder %s533_s7, %s529_s4 }
 0x10f   : > { %p531_p12 = pnand %p530_p9, %p786_p8 }
 0x110   : > { %p536_p5 = por %p535_p3, %p534_p2 }
 0x111   : > { %p532_p1 = pneg %p531_p12 }
 0x113   : > { %p537_p4 = pnand %p536_p5, %p532_p1 }
 0x115   : > { %540 = shalt.err (!%p537_p4)
}
 0x116   : > { %393 = dma.vmem_to_hbm [thread:$0]  (%p786_p8), %s728_s24, 128, %s726_s27, %s267_s28  }
 0x117 PF: > { %p410_p10 = scmp.ge.s32.totalorder %s599_s14, 2  ;;  %s293_s16 = sand.u32 1, %s579_s9  }
 0x118   : > { %p787_p11 = scmp.ne.s32.totalorder %s780_s21, 0  ;;  %s294_s18 = scalar_lea.sflag [#allocation5], %s293_s16 }
 0x11a   : > { %p403_p13 = pnand %p410_p10, %p787_p11 }
 0x11c   : > { %p404_p0 = pneg %p403_p13 }
 0x11e   : > { %574 = dma.done.wait (%p404_p0), %s294_s18, 128  }
 0x11f   : > { %576 = vsyncadd (%p404_p0), %s294_s18, 4294967168  ;;  %s17_s14 = sadd.s32 1, %s599_s14   ;;  %s788_s9 = smov %s583_s10 }
 0x120   : > { %p14_p6 = scmp.ge.s32.totalorder %s17_s14, 4   ;;  %s789_s10 = smov %s587_s11 }
 0x121   : > { %s790_s11 = smov %s674_s22  ;;  %s791_s12 = smov %s595_s13 }
 0x122   : > { %s792_s13 = smov %s794_s17  ;;  %16 = sbr.rel (!%p14_p6) target bundleno = 6 (0x6), region = 74 }
 0x127   :  { %299 = vsyncpa [#allocation4], 1 }
 0x128   :  { %301 = vsyncpa [#allocation4 + $0x1], 1 }
 0x129   :  { %302 = vsyncpa [#allocation7], 1 }
 0x12a   :  { %303 = vsyncpa [#allocation5], 1 }
 0x12b   :  { %305 = vsyncpa [#allocation5 + $0x1], 1 }

</bundles_post_ra>
